<compile_context>
chip_gen: v5e
topology: v5e:2x2
jax: 0.10.0
libtpu: 0.0.40
codegen_flags: <defaults>
</compile_context>

<pallas_src>
import functools

import jax
import jax.numpy as jnp
from jax.experimental import pallas as pl
from jax.experimental.pallas import tpu as pltpu

# Tile limits: multiples of the MXU/vreg native sizes.  Worst case double-buffered
# (x, w, residual, out) tiles + f32 accumulator stay under ~6 MiB, well inside the
# 64 MiB physical VMEM of v7x and the scoped defaults of v5e/v6e.
_TM_MAX = 512
_TN_MAX = 512
_TK_MAX = 512
_VMEM_LIMIT = 48 * 1024 * 1024   # valid on v5e/v6e (128 MiB physical) and v7x (64 MiB)


def _round_up(x, m):
    return ((x + m - 1) // m) * m


def _choose_tile(dim, max_tile, align):
    """Pick (tile, padded_dim): tile % align == 0, tile <= max_tile, minimal padding."""
    dim_p = _round_up(dim, align)
    if dim_p <= max_tile:
        return dim_p, dim_p
    best = None
    n0 = -(-dim_p // max_tile)
    for n in range(n0, n0 + 8):
        tile = _round_up(-(-dim_p // n), align)
        if tile > max_tile:
            continue
        padded = tile * n
        if best is None or padded < best[1]:
            best = (tile, padded)
    return best


# ----------------------------------------------------------------------------
# Pallas kernels
# ----------------------------------------------------------------------------
def _matmul_bias_kernel(x_ref, w_ref, b_ref, *rest, relu, has_res):
    """One (tm, tn) output tile of  out = [relu]((x @ w) + shift [+ residual]).

    Grid = (M/tm, N/tn, K/tk); K (reduction) is the last, "arbitrary" axis.
    acc_ref is an f32 VMEM accumulator persisting across the K steps.
    Matmul runs in bf16 on the MXU; the epilogue stays in f32 (v5e-friendly).
    """
    if has_res:
        res_ref, o_ref, acc_ref = rest
    else:
        o_ref, acc_ref = rest
    k = pl.program_id(2)

    @pl.when(k == 0)
    def _():
        acc_ref[...] = jnp.zeros_like(acc_ref)

    acc_ref[...] += jnp.dot(x_ref[...], w_ref[...],
                            preferred_element_type=jnp.float32)

    @pl.when(k == pl.num_programs(2) - 1)
    def _():
        out = acc_ref[...] + b_ref[...]                 # (1, tn) broadcast
        if has_res:
            out = out + res_ref[...].astype(jnp.float32)
        if relu:
            out = jnp.maximum(out, 0.0)
        o_ref[...] = out.astype(o_ref.dtype)


def _maxpool_kernel(x_ref, o_ref):
    """x_ref: (9, tm, C) window taps; output = elementwise max over the 9 taps."""
    acc = x_ref[0]
    for t in range(1, 9):
        acc = jnp.maximum(acc, x_ref[t])
    o_ref[...] = acc


# ----------------------------------------------------------------------------
# Pallas wrappers
# ----------------------------------------------------------------------------
def matmul_bias_act(x, wpack, residual=None, relu=True, out_dtype=jnp.bfloat16):
    """x: (M, K).  wpack holds pre-padded bf16 weights (Kp, Np), f32 shift (1, Np),
    the logical N, and tile sizes.  residual: (M, N) or None."""
    M, K = x.shape
    N = wpack['n']
    Kp, Np = wpack['w'].shape
    tk, tn = wpack['tk'], wpack['tn']
    tm, Mp = _choose_tile(M, _TM_MAX, 16)                      # bf16 sublane align

    xp = jnp.pad(x.astype(jnp.bfloat16), ((0, Mp - M), (0, Kp - K)))
    inputs = [xp, wpack['w'], wpack['shift']]
    in_specs = [
        pl.BlockSpec((tm, tk), lambda i, j, k: (i, k)),
        pl.BlockSpec((tk, tn), lambda i, j, k: (k, j)),
        pl.BlockSpec((1, tn), lambda i, j, k: (0, j)),
    ]
    if residual is not None:
        rp = jnp.pad(residual.astype(jnp.bfloat16), ((0, Mp - M), (0, Np - N)))
        inputs.append(rp)
        in_specs.append(pl.BlockSpec((tm, tn), lambda i, j, k: (i, j)))

    kernel = functools.partial(_matmul_bias_kernel, relu=relu,
                               has_res=residual is not None)
    out = pl.pallas_call(
        kernel,
        out_shape=jax.ShapeDtypeStruct((Mp, Np), out_dtype),
        grid=(Mp // tm, Np // tn, Kp // tk),
        in_specs=in_specs,
        out_specs=pl.BlockSpec((tm, tn), lambda i, j, k: (i, j)),
        scratch_shapes=[pltpu.VMEM((tm, tn), jnp.float32)],
        compiler_params=pltpu.CompilerParams(
            dimension_semantics=("parallel", "parallel", "arbitrary"),
            vmem_limit_bytes=_VMEM_LIMIT,
        ),
    )(*inputs)
    return out[:M, :N]


def max_pool_3x3_s2_p1(x):
    """x: (B, H, W, C) NHWC -> (B, OH, OW, C), PyTorch MaxPool2d(3, 2, padding=1)."""
    B, H, W, C = x.shape
    neg = float('-inf')
    xp = jnp.pad(x, ((0, 0), (1, 1), (1, 1), (0, 0)), constant_values=neg)
    Hp, Wp = H + 2, W + 2
    oh = (Hp - 3) // 2 + 1
    ow = (Wp - 3) // 2 + 1
    taps = []
    for i in range(3):
        for j in range(3):
            taps.append(xp[:, i:i + 2 * (oh - 1) + 1:2,
                           j:j + 2 * (ow - 1) + 1:2, :])
    stacked = jnp.stack(taps, axis=0).reshape(9, B * oh * ow, C)
    # TODO(synk): extract the 9 window taps inside the kernel (manual DMA over the padded
    # NHWC tensor) instead of materializing the 9x tap stack in HBM.
    M = B * oh * ow
    tm, Mp = _choose_tile(M, 512, 16)
    stacked = jnp.pad(stacked, ((0, 0), (0, Mp - M), (0, 0)), constant_values=neg)

    out = pl.pallas_call(
        _maxpool_kernel,
        out_shape=jax.ShapeDtypeStruct((Mp, C), x.dtype),
        grid=(Mp // tm,),
        in_specs=[pl.BlockSpec((9, tm, C), lambda i: (0, i, 0))],
        out_specs=pl.BlockSpec((tm, C), lambda i: (i, 0)),
        compiler_params=pltpu.CompilerParams(
            dimension_semantics=("parallel",)),
    )(stacked)
    return out[:M].reshape(B, oh, ow, C)


# ----------------------------------------------------------------------------
# JAX glue: im2col (spatial convs only), conv+bn+act, bottleneck block, forward
# ----------------------------------------------------------------------------
def _im2col(x, kh, kw, stride, pad):
    """x: (B, H, W, C) -> patches (B*OH*OW, kh*kw*C), ordering (kh, kw, C)."""
    B, H, W, C = x.shape
    xp = jnp.pad(x, ((0, 0), (pad, pad), (pad, pad), (0, 0)))
    Hp, Wp = H + 2 * pad, W + 2 * pad
    oh = (Hp - kh) // stride + 1
    ow = (Wp - kw) // stride + 1
    cols = []
    for i in range(kh):
        for j in range(kw):
            cols.append(xp[:, i:i + stride * (oh - 1) + 1:stride,
                           j:j + stride * (ow - 1) + 1:stride, :])
    patches = jnp.stack(cols, axis=3)                 # (B, oh, ow, kh*kw, C)
    return patches.reshape(B * oh * ow, kh * kw * C), oh, ow


def conv_bn_act(x, p, stride, pad, relu, residual=None):
    """Fused conv -> BatchNorm(eval, pre-folded into weights) -> (+res) -> (ReLU). x: NHWC."""
    B = x.shape[0]
    if p['kh'] == 1 and p['kw'] == 1:
        xs = x[:, ::stride, ::stride, :] if stride > 1 else x   # 1x1 conv: no im2col
        oh, ow = xs.shape[1], xs.shape[2]
        flat = xs.reshape(B * oh * ow, xs.shape[-1])
    else:
        # TODO(synk): 3x3/7x7 convs still go through an HBM im2col; an implicit-GEMM kernel
        # (tap-reduction grid axis with element-offset windows / manual DMA) would remove
        # the kh*kw read amplification.
        flat, oh, ow = _im2col(x, p['kh'], p['kw'], stride, pad)
    res_flat = None
    if residual is not None:
        res_flat = residual.reshape(B * oh * ow, residual.shape[-1])
    out = matmul_bias_act(flat, p, residual=res_flat, relu=relu,
                          out_dtype=jnp.bfloat16)
    return out.reshape(B, oh, ow, -1)


def bottleneck_forward(x, blk):
    identity = x
    out = conv_bn_act(x, blk['c1'], stride=1, pad=0, relu=True)                 # 1x1
    out = conv_bn_act(out, blk['c2'], stride=blk['stride'], pad=1, relu=True)   # 3x3
    if blk['down'] is not None:
        identity = conv_bn_act(identity, blk['down'], stride=blk['stride'],
                               pad=0, relu=False)                               # 1x1 down
    # conv3 + bn3 + residual add + relu, fused in one kernel call
    out = conv_bn_act(out, blk['c3'], stride=1, pad=0, relu=True, residual=identity)
    return out


def resnet_forward(x_nchw, params):
    x = jnp.transpose(x_nchw, (0, 2, 3, 1)).astype(jnp.bfloat16)   # NCHW -> NHWC, bf16 acts
    x = conv_bn_act(x, params['stem'], stride=2, pad=3, relu=True)
    x = max_pool_3x3_s2_p1(x)
    for layer in params['layers']:
        for blk in layer:
            x = bottleneck_forward(x, blk)
    # AdaptiveAvgPool2d((1,1)) == global mean over spatial dims (glue; trivial reduction)
    x = jnp.mean(x.astype(jnp.float32), axis=(1, 2))               # (B, 2048)
    logits = matmul_bias_act(x, params['fc'], residual=None, relu=False,
                             out_dtype=jnp.float32)
    return logits


# ----------------------------------------------------------------------------
# Deterministic parameter initialization (synthetic weights; no checkpoint)
# BN scale folded into weight columns, weights pre-padded/bf16-cast once here.
# ----------------------------------------------------------------------------
def _prepare_matmul_weights(w2d, shift):
    K, N = w2d.shape
    tk, Kp = _choose_tile(K, _TK_MAX, 128)
    tn, Np = _choose_tile(N, _TN_MAX, 128)
    return {
        'w': jnp.pad(w2d, ((0, Kp - K), (0, Np - N))).astype(jnp.bfloat16),
        'shift': jnp.pad(shift.reshape(1, N).astype(jnp.float32),
                         ((0, 0), (0, Np - N))),
        'n': N, 'tk': tk, 'tn': tn,
    }


def init_conv_bn(key, kh, kw, cin, cout, conv_bias):
    k1, k2, k3, k4, k5 = jax.random.split(key, 5)
    w = jax.random.normal(k1, (kh, kw, cin, cout), jnp.float32) * 0.05
    b = (jax.random.normal(k2, (cout,), jnp.float32) * 0.05
         if conv_bias else jnp.zeros((cout,), jnp.float32))
    gamma = 1.0 + 0.1 * jax.random.normal(k3, (cout,), jnp.float32)
    beta = 0.1 * jax.random.normal(k4, (cout,), jnp.float32)
    mean = 0.1 * jax.random.normal(k5, (cout,), jnp.float32)
    var = jnp.ones((cout,), jnp.float32)
    eps = 1e-5
    # Fold eval-mode BatchNorm: y = ((x*w + b) - mean) * scale + beta
    scale = gamma / jnp.sqrt(var + eps)
    shift = beta + (b - mean) * scale
    w_folded = w.reshape(kh * kw * cin, cout) * scale[None, :]
    p = _prepare_matmul_weights(w_folded, shift)
    p['kh'] = kh
    p['kw'] = kw
    return p


def init_bottleneck(key, cin, cout, stride, has_down):
    k1, k2, k3, k4 = jax.random.split(key, 4)
    return {
        'c1': init_conv_bn(k1, 1, 1, cin, cout, conv_bias=False),
        'c2': init_conv_bn(k2, 3, 3, cout, cout, conv_bias=False),
        'c3': init_conv_bn(k3, 1, 1, cout, cout * 4, conv_bias=False),
        # identity_down uses nn.Conv2d default bias=True in the reference module
        'down': init_conv_bn(k4, 1, 1, cin, cout * 4, conv_bias=True) if has_down else None,
        'stride': stride,
    }


def init_resnet(key, num_layers, img_channels, num_classes):
    keys = jax.random.split(key, 7)
    params = {'stem': init_conv_bn(keys[0], 7, 7, img_channels, 64, conv_bias=True)}
    in_ch = 64
    layers = []
    for li, (n, oc) in enumerate(zip(num_layers, [64, 128, 256, 512])):
        stride = 1 if li == 0 else 2
        lkeys = jax.random.split(keys[1 + li], n)
        has_down = (stride != 1) or (in_ch != oc * 4)
        blocks = [init_bottleneck(lkeys[0], in_ch, oc, stride, has_down)]
        in_ch = oc * 4
        for b in range(1, n):
            blocks.append(init_bottleneck(lkeys[b], in_ch, oc, 1, False))
        layers.append(blocks)
    params['layers'] = layers
    kfc1, kfc2 = jax.random.split(keys[5])
    fc_w = jax.random.normal(kfc1, (512 * 4, num_classes), jnp.float32) * 0.02
    fc_b = jax.random.normal(kfc2, (num_classes,), jnp.float32) * 0.02
    params['fc'] = _prepare_matmul_weights(fc_w, fc_b)
    return params


# ----------------------------------------------------------------------------
if __name__ == "__main__":
    key = jax.random.PRNGKey(0)
    kp, kx = jax.random.split(key)

    num_layers = [1, 1, 1, 1]     # smallest bottleneck ResNet
    img_channels = 3
    num_classes = 10

    params = init_resnet(kp, num_layers, img_channels, num_classes)
    x = jax.random.normal(kx, (2, img_channels, 16, 16), jnp.float32)   # NCHW, like PyTorch

    out = resnet_forward(x, params)
    out = jax.block_until_ready(out)
    assert out.shape == (2, num_classes), out.shape
    assert jnp.all(jnp.isfinite(out))
    print("KERNEL_OK")
</pallas_src>

<mosaic_0001>
module attributes {stable_mosaic.version = 11 : i64} {
  func.func @_matmul_bias_kernel(%arg0: i32, %arg1: i32, %arg2: i32, %arg3: memref<128x256xbf16, #tpu.memory_space<vmem>>, %arg4: memref<256x128xbf16, #tpu.memory_space<vmem>>, %arg5: memref<1x128xf32, #tpu.memory_space<vmem>>, %arg6: memref<128x128xbf16, #tpu.memory_space<vmem>>, %arg7: memref<128x128xf32, #tpu.memory_space<vmem>>) attributes {dimension_semantics = [#tpu.dimension_semantics<parallel>, #tpu.dimension_semantics<parallel>, #tpu.dimension_semantics<arbitrary>], iteration_bounds = array<i64: 1, 1, 1>, scalar_prefetch = 0 : i64, scratch_operands = 1 : i64, tpu.core_type = #tpu.core_type<tc>, window_params = [{transform_indices = @transform_0, window_bounds = array<i64: 128, 256>}, {transform_indices = @transform_1, window_bounds = array<i64: 256, 128>}, {transform_indices = @transform_2, window_bounds = array<i64: 1, 128>}, {transform_indices = @transform_3, window_bounds = array<i64: 128, 128>}]} {
    %c0_i32 = arith.constant 0 : i32
    %0 = arith.cmpi eq, %arg2, %c0_i32 : i32
    %1 = arith.extui %0 : i1 to i32
    %c0_i32_0 = arith.constant 0 : i32
    %2 = arith.cmpi ne, %1, %c0_i32_0 : i32
    scf.if %2 {
      %cst_10 = arith.constant 0.000000e+00 : f32
      %12 = vector.broadcast %cst_10 : f32 to vector<128x128xf32>
      %c0_11 = arith.constant 0 : index
      %c0_12 = arith.constant 0 : index
      %13 = vector.load %arg7[%c0_11, %c0_12] : memref<128x128xf32, #tpu.memory_space<vmem>>, vector<128x128xf32>
      tpu.vector_store %arg7[%c0_11, %c0_12], %12 {strides = array<i32>} : memref<128x128xf32, #tpu.memory_space<vmem>>, vector<128x128xf32>,
    } else {
    }
    %c0 = arith.constant 0 : index
    %c0_1 = arith.constant 0 : index
    %3 = vector.load %arg7[%c0, %c0_1] : memref<128x128xf32, #tpu.memory_space<vmem>>, vector<128x128xf32>
    %c0_2 = arith.constant 0 : index
    %c0_3 = arith.constant 0 : index
    %4 = vector.load %arg3[%c0_2, %c0_3] : memref<128x256xbf16, #tpu.memory_space<vmem>>, vector<128x256xbf16>
    %c0_4 = arith.constant 0 : index
    %c0_5 = arith.constant 0 : index
    %5 = vector.load %arg4[%c0_4, %c0_5] : memref<256x128xbf16, #tpu.memory_space<vmem>>, vector<256x128xbf16>
    %cst = arith.constant dense<0.000000e+00> : vector<128x128xf32>
    %6 = tpu.matmul %4, %5, %cst {dimension_numbers = #tpu.dot_dimension_numbers<[1], [0], [0], [1], [0, 0, 1, 1], [], []>} : vector<128x256xbf16>, vector<256x128xbf16>, vector<128x128xf32> -> vector<128x128xf32>
    %7 = arith.addf %3, %6 : vector<128x128xf32>
    %c0_6 = arith.constant 0 : index
    %c0_7 = arith.constant 0 : index
    %8 = vector.load %arg7[%c0_6, %c0_7] : memref<128x128xf32, #tpu.memory_space<vmem>>, vector<128x128xf32>
    tpu.vector_store %arg7[%c0_6, %c0_7], %7 {strides = array<i32>} : memref<128x128xf32, #tpu.memory_space<vmem>>, vector<128x128xf32>,
    %c0_i32_8 = arith.constant 0 : i32
    %9 = arith.cmpi eq, %arg2, %c0_i32_8 : i32
    %10 = arith.extui %9 : i1 to i32
    %c0_i32_9 = arith.constant 0 : i32
    %11 = arith.cmpi ne, %10, %c0_i32_9 : i32
    scf.if %11 {
      %c0_10 = arith.constant 0 : index
      %c0_11 = arith.constant 0 : index
      %12 = vector.load %arg7[%c0_10, %c0_11] : memref<128x128xf32, #tpu.memory_space<vmem>>, vector<128x128xf32>
      %c0_12 = arith.constant 0 : index
      %c0_13 = arith.constant 0 : index
      %13 = vector.load %arg5[%c0_12, %c0_13] : memref<1x128xf32, #tpu.memory_space<vmem>>, vector<1x128xf32>
      %14 = vector.broadcast %13 : vector<1x128xf32> to vector<128x128xf32>
      %15 = arith.addf %12, %14 : vector<128x128xf32>
      %cst_14 = arith.constant 0.000000e+00 : f32
      %16 = vector.broadcast %cst_14 : f32 to vector<128x128xf32>
      %17 = arith.maximumf %15, %16 : vector<128x128xf32>
      %18 = arith.truncf %17 : vector<128x128xf32> to vector<128x128xbf16>
      %c0_15 = arith.constant 0 : index
      %c0_16 = arith.constant 0 : index
      %19 = vector.load %arg6[%c0_15, %c0_16] : memref<128x128xbf16, #tpu.memory_space<vmem>>, vector<128x128xbf16>
      tpu.vector_store %arg6[%c0_15, %c0_16], %18 {strides = array<i32>} : memref<128x128xbf16, #tpu.memory_space<vmem>>, vector<128x128xbf16>,
    } else {
    }
    return
  }
  func.func @transform_0(%arg0: i32, %arg1: i32, %arg2: i32) -> (i32, i32) {
    %c0_i32 = arith.constant 0 : i32
    return %arg0, %arg2 : i32, i32
  }
  func.func @transform_1(%arg0: i32, %arg1: i32, %arg2: i32) -> (i32, i32) {
    %c0_i32 = arith.constant 0 : i32
    return %arg2, %arg1 : i32, i32
  }
  func.func @transform_2(%arg0: i32, %arg1: i32, %arg2: i32) -> (i32, i32) {
    %c0_i32 = arith.constant 0 : i32
    %c0_i32_0 = arith.constant 0 : i32
    return %c0_i32, %arg1 : i32, i32
  }
  func.func @transform_3(%arg0: i32, %arg1: i32, %arg2: i32) -> (i32, i32) {
    %c0_i32 = arith.constant 0 : i32
    return %arg0, %arg1 : i32, i32
  }
}

</mosaic_0001>

<bundles_post_ra>
// kernel: tpu_custom_call.1
= control target key start
LH: loop header
LB: loop body
LE: loop exit
PB: predicated region body
PF: predicated region fallthrough
CT: control target
= control target key end

     0   :  { %8 = vsyncpa [#allocation4], 0  ;;  %s916_s0 = inlined_call_operand.hbm [shape: bf16[128,256], index: 0, kind: input, shape index: {}]   ;;  %s917_s1 = inlined_call_operand.hbm [shape: bf16[256,128], index: 1, kind: input, shape index: {}]   ;;  %s918_s2 = inlined_call_operand.vmem [shape: f32[1,128], index: 2, kind: input, shape index: {}]   ;;  %s919_s3 = inlined_call_operand.hbm [shape: bf16[128,128], index: 3, kind: output, shape index: {}]  }
   0x1   :  { %9 = vsyncpa [#allocation7], 0 }
   0x2   :  { %10 = vsyncpa [#allocation5], 0  ;;  %s15_s14 = sshll.u32 %s916_s0, 4  ;;  %s853_s15 = smov [#allocation3]   ;;  %s16_s14 = int_to_ptr.hbm [resolvable:$true] %s15_s14 }
   0x3   :  { %s17_s16 = sshll.u32 %s853_s15, 4  ;;  %s28_s19 = sshll.u32 %s917_s1, 4  ;;  %s18_s16 = int_to_ptr.vmem [resolvable:$true] %s17_s16  ;;  %s29_s19 = int_to_ptr.hbm [resolvable:$true] %s28_s19 }
   0x4   :  { %s854_s20 = smov 128   ;;  %s855_s21 = smov 8  }
   0x5   :  { %23 = dma.hbm_to_vmem [thread:$0]  %s16_s14, 2048, %s18_s16, [#allocation4], %s854_s20, %s854_s20, %s855_s21  }
   0x6   :  { %s856_s22 = smov [#allocation6]   ;;  %s857_s24 = smov 64  }
   0x7   :  { %s30_s23 = sshll.u32 %s856_s22, 4  ;;  %s858_s25 = smov 4   ;;  %s31_s23 = int_to_ptr.vmem [resolvable:$true] %s30_s23 }
   0x8   :  { %36 = dma.hbm_to_vmem [thread:$0]  %s29_s19, 2048, %s31_s23, [#allocation7], %s857_s24, %s857_s24, %s858_s25  }
   0x9   :  { %847 = dma.done.wait [#allocation4], 2048  }
   0xa   :  { %848 = vsyncadd [#allocation4], 4294965248 }
   0xb   :  { %849 = dma.done.wait [#allocation7], 2048  }
   0xc   :  { %850 = vsyncadd [#allocation7], 4294965248  ;;  %v695_v0 = vld [vmem:[#allocation6 + $0x38] sm:$0xff]  ;;  %v694_v2 = vld [vmem:[#allocation6 + $0x30] sm:$0xff]  ;;  %s530_s29 = sshll.u32 %s919_s3, 4  ;;  %s531_s29 = int_to_ptr.hbm [resolvable:$true] %s530_s29 }
   0xd   :  { %v703_v1 = vld [vmem:[#allocation6 + $0x78] sm:$0xff]  ;;  %307 = vmatpush.bf16.msra.mxu0 %v695_v0  ;;  %751 = vmatpush.bf16.msra.mxu2 %v695_v0  ;;  %v702_v3 = vld [vmem:[#allocation6 + $0x70] sm:$0xff]  ;;  %v693_v4 = vld [vmem:[#allocation6 + $0x28] sm:$0xff] }
   0xe   :  { %356 = vmatpush.bf16.msra.mxu1 %v703_v1  ;;  %759 = vmatpush.bf16.msra.mxu3 %v703_v1  ;;  %v701_v5 = vld [vmem:[#allocation6 + $0x68] sm:$0xff]  ;;  %v692_v6 = vld [vmem:[#allocation6 + $0x20] sm:$0xff]  ;;  %v691_v8 = vld [vmem:[#allocation6 + $0x18] sm:$0xff] }
   0xf   :  { %v700_v7 = vld [vmem:[#allocation6 + $0x60] sm:$0xff]  ;;  %v699_v9 = vld [vmem:[#allocation6 + $0x58] sm:$0xff]  ;;  %v690_v10 = vld [vmem:[#allocation6 + $0x10] sm:$0xff] }
  0x10   :  { %v698_v11 = vld [vmem:[#allocation6 + $0x50] sm:$0xff]  ;;  %v689_v12 = vld [vmem:[#allocation6 + $0x8] sm:$0xff]  ;;  %v688_v14 = vld [vmem:[#allocation6] sm:$0xff] }
  0x11   :  { %308 = vmatpush.bf16.msra.mxu0 %v694_v2  ;;  %752 = vmatpush.bf16.msra.mxu2 %v694_v2  ;;  %v697_v13 = vld [vmem:[#allocation6 + $0x48] sm:$0xff]  ;;  %v696_v15 = vld [vmem:[#allocation6 + $0x40] sm:$0xff]  ;;  %v554_v28 = vld [vmem:[#allocation3 + $0x10] sm:$0xf] }
  0x12   :  { %357 = vmatpush.bf16.msra.mxu1 %v702_v3  ;;  %760 = vmatpush.bf16.msra.mxu3 %v702_v3  ;;  %v546_v16 = vld [vmem:[#allocation3] sm:$0xf]  ;;  %v673_v17 = vld [vmem:[#allocation3 + $0x4] sm:$0xf0]  ;;  %v672_v20 = vld [vmem:[#allocation3 + $0x4] sm:$0xf] }
  0x13   :  { %v578_v18 = vld [vmem:[#allocation3 + $0x40] sm:$0xf]  ;;  %v681_v19 = vld [vmem:[#allocation3 + $0x44] sm:$0xf0]  ;;  %v548_v21 = vld [vmem:[#allocation3 + $0x8] sm:$0xf0]  ;;  %v547_v24 = vor.u32 %v673_v17, %v546_v16 }
  0x14   :  { %v680_v22 = vld [vmem:[#allocation3 + $0x44] sm:$0xf]  ;;  %v580_v23 = vld [vmem:[#allocation3 + $0x48] sm:$0xf0]  ;;  %v579_v25 = vor.u32 %v681_v19, %v578_v18  ;;  %v551_v26 = vor.u32 %v672_v20, %v548_v21  ;;  %v675_v29 = vld [vmem:[#allocation3 + $0x14] sm:$0xf0] }
  0x15   :  { %309 = vmatpush.bf16.msra.mxu0 %v693_v4  ;;  %753 = vmatpush.bf16.msra.mxu2 %v693_v4  ;;  %v583_v27 = vor.u32 %v680_v22, %v580_v23  ;;  %v586_v30 = vld [vmem:[#allocation3 + $0x50] sm:$0xf]  ;;  %v683_v31 = vld [vmem:[#allocation3 + $0x54] sm:$0xf0]  ;;  %v674_v32 = vld [vmem:[#allocation3 + $0x14] sm:$0xf]  ;;  %v555_v36 = vor.u32 %v675_v29, %v554_v28 }
  0x16   :  { %358 = vmatpush.bf16.msra.mxu1 %v701_v5  ;;  %761 = vmatpush.bf16.msra.mxu3 %v701_v5  ;;  %v556_v33 = vld [vmem:[#allocation3 + $0x18] sm:$0xf0]  ;;  %v682_v34 = vld [vmem:[#allocation3 + $0x54] sm:$0xf]  ;;  %v587_v37 = vor.u32 %v683_v31, %v586_v30  ;;  %v562_v40 = vld [vmem:[#allocation3 + $0x20] sm:$0xf] }
  0x17   :  { %v588_v35 = vld [vmem:[#allocation3 + $0x58] sm:$0xf0]  ;;  %v559_v38 = vor.u32 %v674_v32, %v556_v33  ;;  %v677_v41 = vld [vmem:[#allocation3 + $0x24] sm:$0xf0]  ;;  %v594_v42 = vld [vmem:[#allocation3 + $0x60] sm:$0xf] }
  0x18   :  { %v591_v39 = vor.u32 %v682_v34, %v588_v35  ;;  %v685_v43 = vld [vmem:[#allocation3 + $0x64] sm:$0xf0]  ;;  %v676_v44 = vld [vmem:[#allocation3 + $0x24] sm:$0xf]  ;;  %v564_v45 = vld [vmem:[#allocation3 + $0x28] sm:$0xf0]  ;;  %v563_v48 = vor.u32 %v677_v41, %v562_v40 }
  0x19   :  { %310 = vmatpush.bf16.msra.mxu0 %v692_v6  ;;  %754 = vmatpush.bf16.msra.mxu2 %v692_v6  ;;  %v684_v46 = vld [vmem:[#allocation3 + $0x64] sm:$0xf]  ;;  %v596_v47 = vld [vmem:[#allocation3 + $0x68] sm:$0xf0]  ;;  %v595_v49 = vor.u32 %v685_v43, %v594_v42  ;;  %v567_v50 = vor.u32 %v676_v44, %v564_v45  ;;  %v570_v52 = vld [vmem:[#allocation3 + $0x30] sm:$0xf] }
  0x1a   :  { %359 = vmatpush.bf16.msra.mxu1 %v700_v7  ;;  %762 = vmatpush.bf16.msra.mxu3 %v700_v7  ;;  %v599_v51 = vor.u32 %v684_v46, %v596_v47  ;;  %v679_v53 = vld [vmem:[#allocation3 + $0x34] sm:$0xf0]  ;;  %v602_v54 = vld [vmem:[#allocation3 + $0x70] sm:$0xf]  ;;  %v678_v56 = vld [vmem:[#allocation3 + $0x34] sm:$0xf] }
  0x1b   :  { %v687_v55 = vld [vmem:[#allocation3 + $0x74] sm:$0xf0]  ;;  %v572_v57 = vld [vmem:[#allocation3 + $0x38] sm:$0xf0]  ;;  %v686_v58 = vld [vmem:[#allocation3 + $0x74] sm:$0xf]  ;;  %v571_v60 = vor.u32 %v679_v53, %v570_v52 }
  0x1c   :  { %v604_v59 = vld [vmem:[#allocation3 + $0x78] sm:$0xf0]  ;;  %v603_v61 = vor.u32 %v687_v55, %v602_v54  ;;  %v575_v62 = vor.u32 %v678_v56, %v572_v57  ;;  %v892_v3 = vld [vmem:[%s918_s2] ss:$0 sm:$0xff]  ;;  %s859_s2 = smov [#allocation8]  }
  0x1d   :  { %311 = vmatpush.bf16.msra.mxu0 %v691_v8  ;;  %755 = vmatpush.bf16.msra.mxu2 %v691_v8  ;;  %v607_v63 = vor.u32 %v686_v58, %v604_v59  ;;  %s528_s26 = sshll.u32 %s859_s2, 4  ;;  %s529_s26 = int_to_ptr.vmem [resolvable:$true] %s528_s26 }
  0x1e   :  { %360 = vmatpush.bf16.msra.mxu1 %v699_v9  ;;  %763 = vmatpush.bf16.msra.mxu3 %v699_v9 }
  0x21   :  { %312 = vmatpush.bf16.msra.mxu0 %v690_v10  ;;  %756 = vmatpush.bf16.msra.mxu2 %v690_v10 }
  0x22   :  { %361 = vmatpush.bf16.msra.mxu1 %v698_v11  ;;  %764 = vmatpush.bf16.msra.mxu3 %v698_v11 }
  0x25   :  { %313 = vmatpush.bf16.msra.mxu0 %v689_v12  ;;  %757 = vmatpush.bf16.msra.mxu2 %v689_v12 }
  0x26   :  { %362 = vmatpush.bf16.msra.mxu1 %v697_v13  ;;  %765 = vmatpush.bf16.msra.mxu3 %v697_v13 }
  0x29   :  { %314 = vmatpush.bf16.msra.mxu0 %v688_v14  ;;  %758 = vmatpush.bf16.msra.mxu2 %v688_v14 }
  0x2a   :  { %363 = vmatpush.bf16.msra.mxu1 %v696_v15  ;;  %766 = vmatpush.bf16.msra.mxu3 %v696_v15 }
  0x2c   :  { %315 = vmatmul.bf16.vlgmr.msra.gmra.mxu0 %v547_v24  ;;  %335 = vmatmul.bf16.vlgmr.msra.gmra.mxu2 %v579_v25 }
  0x2d   :  { %364 = vmatmul.bf16.vlgmr.msra.gmra.mxu1 %v551_v26  ;;  %384 = vmatmul.bf16.vlgmr.msra.gmra.mxu3 %v583_v27 }
  0x3c   :  { %320 = vmatmul.bf16.gmra.mxu0 %v555_v36  ;;  %340 = vmatmul.bf16.gmra.mxu2 %v587_v37 }
  0x3d   :  { %369 = vmatmul.bf16.gmra.mxu1 %v559_v38  ;;  %389 = vmatmul.bf16.gmra.mxu3 %v591_v39 }
  0x4c   :  { %325 = vmatmul.bf16.gmra.mxu0 %v563_v48  ;;  %345 = vmatmul.bf16.gmra.mxu2 %v595_v49 }
  0x4d   :  { %374 = vmatmul.bf16.gmra.mxu1 %v567_v50  ;;  %394 = vmatmul.bf16.gmra.mxu3 %v599_v51 }
  0x5c   :  { %330 = vmatmul.bf16.gmra.mxu0 %v571_v60  ;;  %350 = vmatmul.bf16.gmra.mxu2 %v603_v61 }
  0x5d   :  { %379 = vmatmul.bf16.gmra.mxu1 %v575_v62  ;;  %399 = vmatmul.bf16.gmra.mxu3 %v607_v63 }
  0xa9   :  { %v316_v0 = vpop.f32.mrf.mxu0 }
  0xaa   :  { %v365_v1 = vpop.f32.mrf.mxu1 }
  0xab   :  { %v366_v2 = vadd.f32 %v365_v1, %v316_v0 }
  0xad   :  { %v460_v8 = vadd.f32 %v892_v3, %v366_v2 }
  0xaf   :  { %v336_v4 = vpop.f32.mrf.mxu2  ;;  %v476_v12 = vmax.f32 %v460_v8, 0.0 }
  0xb0   :  { %v385_v5 = vpop.f32.mrf.mxu3 }
  0xb1   :  { %v318_v6 = vpop.f32.mrf.mxu0  ;;  %v386_v10 = vadd.f32 %v385_v5, %v336_v4 }
  0xb2   :  { %v367_v7 = vpop.f32.mrf.mxu1 }
  0xb3   :  { %v368_v9 = vadd.f32 %v367_v7, %v318_v6  ;;  %v468_v16 = vadd.f32 %v892_v3, %v386_v10 }
  0xb5   :  { %v461_v11 = vadd.f32 %v892_v3, %v368_v9  ;;  %v484_v22 = vmax.f32 %v468_v16, 0.0 }
  0xb7   :  { %v477_v13 = vmax.f32 %v461_v11, 0.0  ;;  %v338_v14 = vpop.f32.mrf.mxu2 }
  0xb8   :  { %v387_v15 = vpop.f32.mrf.mxu3 }
  0xb9   :  { %v707_v17 = vpack.c.bf16 %v477_v13, %v476_v12  ;;  %v388_v18 = vadd.f32 %v387_v15, %v338_v14  ;;  %v321_v19 = vpop.f32.mrf.mxu0 }
  0xba   :  { %v370_v20 = vpop.f32.mrf.mxu1 }
  0xbb   :  { %708 = vst [vmem:[#allocation8] sm:$0xff] %v707_v17   ;;  %v469_v21 = vadd.f32 %v892_v3, %v388_v18  ;;  %v371_v25 = vadd.f32 %v370_v20, %v321_v19 }
  0xbd   :  { %v485_v23 = vmax.f32 %v469_v21, 0.0  ;;  %v462_v30 = vadd.f32 %v892_v3, %v371_v25 }
  0xbf   :  { %v727_v24 = vpack.c.bf16 %v485_v23, %v484_v22  ;;  %v341_v26 = vpop.f32.mrf.mxu2  ;;  %v478_v34 = vmax.f32 %v462_v30, 0.0 }
  0xc0   :  { %v390_v27 = vpop.f32.mrf.mxu3 }
  0xc1   :  { %747 = vst [vmem:[#allocation8 + $0x20] sm:$0xff] %v727_v24   ;;  %v323_v28 = vpop.f32.mrf.mxu0  ;;  %v391_v32 = vadd.f32 %v390_v27, %v341_v26 }
  0xc2   :  { %v372_v29 = vpop.f32.mrf.mxu1 }
  0xc3   :  { %v373_v31 = vadd.f32 %v372_v29, %v323_v28  ;;  %v470_v38 = vadd.f32 %v892_v3, %v391_v32 }
  0xc5   :  { %v463_v33 = vadd.f32 %v892_v3, %v373_v31  ;;  %v486_v44 = vmax.f32 %v470_v38, 0.0 }
  0xc7   :  { %v479_v35 = vmax.f32 %v463_v33, 0.0  ;;  %v343_v36 = vpop.f32.mrf.mxu2 }
  0xc8   :  { %v392_v37 = vpop.f32.mrf.mxu3 }
  0xc9   :  { %v712_v39 = vpack.c.bf16 %v479_v35, %v478_v34  ;;  %v393_v40 = vadd.f32 %v392_v37, %v343_v36  ;;  %v326_v41 = vpop.f32.mrf.mxu0 }
  0xca   :  { %v375_v42 = vpop.f32.mrf.mxu1 }
  0xcb   :  { %744 = vst [vmem:[#allocation8 + $0x8] sm:$0xff] %v712_v39   ;;  %v471_v43 = vadd.f32 %v892_v3, %v393_v40  ;;  %v376_v47 = vadd.f32 %v375_v42, %v326_v41 }
  0xcd   :  { %v487_v45 = vmax.f32 %v471_v43, 0.0  ;;  %v464_v52 = vadd.f32 %v892_v3, %v376_v47 }
  0xcf   :  { %v732_v46 = vpack.c.bf16 %v487_v45, %v486_v44  ;;  %v346_v48 = vpop.f32.mrf.mxu2  ;;  %v480_v56 = vmax.f32 %v464_v52, 0.0 }
  0xd0   :  { %v395_v49 = vpop.f32.mrf.mxu3 }
  0xd1   :  { %748 = vst [vmem:[#allocation8 + $0x28] sm:$0xff] %v732_v46   ;;  %v328_v50 = vpop.f32.mrf.mxu0  ;;  %v396_v54 = vadd.f32 %v395_v49, %v346_v48 }
  0xd2   :  { %v377_v51 = vpop.f32.mrf.mxu1 }
  0xd3   :  { %v378_v53 = vadd.f32 %v377_v51, %v328_v50  ;;  %v472_v60 = vadd.f32 %v892_v3, %v396_v54 }
  0xd5   :  { %v465_v55 = vadd.f32 %v892_v3, %v378_v53  ;;  %v488_v2 = vmax.f32 %v472_v60, 0.0 }
  0xd7   :  { %v481_v57 = vmax.f32 %v465_v55, 0.0  ;;  %v348_v58 = vpop.f32.mrf.mxu2 }
  0xd8   :  { %v397_v59 = vpop.f32.mrf.mxu3 }
  0xd9   :  { %v717_v61 = vpack.c.bf16 %v481_v57, %v480_v56  ;;  %v398_v62 = vadd.f32 %v397_v59, %v348_v58  ;;  %v331_v63 = vpop.f32.mrf.mxu0 }
  0xda   :  { %v380_v0 = vpop.f32.mrf.mxu1 }
  0xdb   :  { %745 = vst [vmem:[#allocation8 + $0x10] sm:$0xff] %v717_v61   ;;  %v473_v1 = vadd.f32 %v892_v3, %v398_v62  ;;  %v381_v6 = vadd.f32 %v380_v0, %v331_v63 }
  0xdd   :  { %v489_v4 = vmax.f32 %v473_v1, 0.0  ;;  %v466_v11 = vadd.f32 %v892_v3, %v381_v6 }
  0xdf   :  { %v737_v5 = vpack.c.bf16 %v489_v4, %v488_v2  ;;  %v351_v7 = vpop.f32.mrf.mxu2  ;;  %v482_v15 = vmax.f32 %v466_v11, 0.0 }
  0xe0   :  { %v400_v8 = vpop.f32.mrf.mxu3 }
  0xe1   :  { %749 = vst [vmem:[#allocation8 + $0x30] sm:$0xff] %v737_v5   ;;  %v333_v9 = vpop.f32.mrf.mxu0  ;;  %v401_v13 = vadd.f32 %v400_v8, %v351_v7 }
  0xe2   :  { %v382_v10 = vpop.f32.mrf.mxu1 }
  0xe3   :  { %v383_v12 = vadd.f32 %v382_v10, %v333_v9  ;;  %v474_v19 = vadd.f32 %v892_v3, %v401_v13 }
  0xe5   :  { %v467_v14 = vadd.f32 %v892_v3, %v383_v12  ;;  %v490_v23 = vmax.f32 %v474_v19, 0.0 }
  0xe7   :  { %v483_v16 = vmax.f32 %v467_v14, 0.0  ;;  %v353_v17 = vpop.f32.mrf.mxu2 }
  0xe8   :  { %v402_v18 = vpop.f32.mrf.mxu3 }
  0xe9   :  { %v722_v20 = vpack.c.bf16 %v483_v16, %v482_v15  ;;  %v403_v21 = vadd.f32 %v402_v18, %v353_v17 }
  0xeb   :  { %746 = vst [vmem:[#allocation8 + $0x18] sm:$0xff] %v722_v20   ;;  %v475_v22 = vadd.f32 %v892_v3, %v403_v21 }
  0xed   :  { %v491_v24 = vmax.f32 %v475_v22, 0.0 }
  0xef   :  { %v742_v25 = vpack.c.bf16 %v491_v24, %v490_v23 }
  0xf1   :  { %750 = vst [vmem:[#allocation8 + $0x38] sm:$0xff] %v742_v25  }
  0xf2   :  { %536 = dma.vmem_to_hbm [thread:$0]  %s529_s26, 1024, %s531_s29, [#allocation5], %s857_s24, %s857_s24, %s858_s25  }
  0xf3   :  { %851 = dma.done.wait [#allocation5], 1024  }
  0xf4   :  { %852 = vsyncadd [#allocation5], 4294966272 }
  0xf5   :  { %541 = vsyncpa [#allocation4], 1 }
  0xf6   :  { %542 = vsyncpa [#allocation7], 1 }
  0xf7   :  { %543 = vsyncpa [#allocation5], 1 }

</bundles_post_ra>
